<compile_context>
chip_gen: v6e
topology: v6e:2x2x1
jax: 0.10.0
libtpu: 0.0.40
codegen_flags: <defaults>
</compile_context>

<pallas_src>
import functools

import numpy as np
import jax
import jax.numpy as jnp
from jax.experimental import pallas as pl
from jax.experimental.pallas import tpu as pltpu


# ----------------------------------------------------------------------------
# Pallas kernel
# ----------------------------------------------------------------------------
def _volume_kernel(yp_ref, yt_ref, accp_ref, acct_ref, *, acc_w, tail_valid):
    """grid = (n_tiles,)   (reduction axis, "arbitrary")

    yp_ref / yt_ref : (R, TILE)  native-dtype mask tiles; R = C * S packed rows
    accp / acct     : (R, acc_w) f32 output accumulators (block index constant
                      across the grid -> resident in VMEM, written back once)
    acc_w           : static accumulator width (multiple of 128)
    tail_valid      : static int (valid lanes in the LAST tile) or None
    """
    k = pl.program_id(0)
    nk = pl.num_programs(0)

    @pl.when(k == 0)
    def _init():
        accp_ref[...] = jnp.zeros_like(accp_ref)
        acct_ref[...] = jnp.zeros_like(acct_ref)

    def add_tile(x_ref, acc_ref, masked):
        width = x_ref.shape[1]
        n_full = width // acc_w
        if n_full:
            acc = acc_ref[...]                       # read accumulator once
            for j in range(n_full):                  # unrolled: vld + vadd per vreg
                chunk = x_ref[:, j * acc_w:(j + 1) * acc_w].astype(jnp.float32)
                if masked:
                    lane = (jax.lax.broadcasted_iota(jnp.int32, chunk.shape, 1)
                            + j * acc_w)
                    chunk = jnp.where(lane < tail_valid, chunk, 0.0)
                acc = acc + chunk
            acc_ref[...] = acc                       # write accumulator once
        rem = width - n_full * acc_w
        if rem:
            # Only reachable in the single-tile path (multi-tile widths are
            # multiples of acc_w), which never needs lane masking.
            chunk = x_ref[:, n_full * acc_w:].astype(jnp.float32)
            acc_ref[:, :rem] = acc_ref[:, :rem] + chunk

    if tail_valid is None:
        add_tile(yp_ref, accp_ref, False)
        add_tile(yt_ref, acct_ref, False)
    else:
        @pl.when(k < nk - 1)
        def _full():
            add_tile(yp_ref, accp_ref, False)
            add_tile(yt_ref, acct_ref, False)

        @pl.when(k == nk - 1)
        def _tail():
            add_tile(yp_ref, accp_ref, True)
            add_tile(yt_ref, acct_ref, True)


# ----------------------------------------------------------------------------
# jit-wrapped driver (reshape + pallas_call + tiny epilogue fuse under one jit)
# ----------------------------------------------------------------------------
def _tissue_volume_impl(y_pred, y_true, voxel_area, tissue_mask, *, max_tile_bytes):
    assert y_pred.shape == y_true.shape and y_pred.ndim == 4 and y_pred.shape[0] == 1
    _, C, H, W = y_pred.shape
    hw = H * W

    if y_pred.dtype == jnp.bool_:
        y_pred = y_pred.astype(jnp.float32)
    if y_true.dtype == jnp.bool_:
        y_true = y_true.astype(jnp.float32)

    # Sublane packing: S consecutive spatial chunks per class on S consecutive
    # sublanes so small C fills the 8 f32 sublanes of every vreg.
    S = 8 if hw % 8 == 0 else (4 if hw % 4 == 0 else (2 if hw % 2 == 0 else 1))
    R = C * S
    wtot = hw // S

    yp = y_pred.reshape(R, wtot)     # contiguous reshape: no data movement
    yt = y_true.reshape(R, wtot)
    itemsize = jnp.dtype(yp.dtype).itemsize

    # Accumulator width: <= ~16 vregs of f32, multiple of 128, clamped to the
    # 128-rounded spatial width.
    acc_w = max(128, min(1024, ((64 * 1024) // (R * 4)) // 128 * 128))
    acc_w = min(acc_w, 128 * pl.cdiv(wtot, 128))

    # Tile sizing: multiple of acc_w, ~max_tile_bytes per input per grid step.
    # Double-buffered working set = 2 inputs x 2 bufs x tile bytes (+ two small
    # accumulators), comfortably inside every generation's scoped VMEM budget.
    tile = (max_tile_bytes // (R * itemsize)) // acc_w * acc_w
    tile = max(tile, acc_w)
    if wtot <= tile:
        tile = wtot                   # one full-width block (legal even if %128 != 0)
        n_tiles = 1
        tail_valid = None
    else:
        assert tile % acc_w == 0
        n_tiles = pl.cdiv(wtot, tile)
        rem = wtot - (n_tiles - 1) * tile
        tail_valid = rem if rem != tile else None

    kernel = functools.partial(_volume_kernel, acc_w=acc_w, tail_valid=tail_valid)

    accp, acct = pl.pallas_call(
        kernel,
        out_shape=(jax.ShapeDtypeStruct((R, acc_w), jnp.float32),
                   jax.ShapeDtypeStruct((R, acc_w), jnp.float32)),
        grid=(n_tiles,),
        in_specs=[pl.BlockSpec((R, tile), lambda k: (0, k)),
                  pl.BlockSpec((R, tile), lambda k: (0, k))],
        out_specs=(pl.BlockSpec((R, acc_w), lambda k: (0, 0)),
                   pl.BlockSpec((R, acc_w), lambda k: (0, 0))),
        compiler_params=pltpu.CompilerParams(
            dimension_semantics=("arbitrary",),
            vmem_limit_bytes=32 * 1024 * 1024,
        ),
        cost_estimate=pl.CostEstimate(
            flops=4 * C * hw,
            transcendentals=0,
            bytes_accessed=2 * C * hw * itemsize + 2 * R * acc_w * 4,
        ),
    )(yp, yt)

    # Tiny epilogue (fused by XLA under jit): fold packed rows + accumulator
    # lanes, scale by voxel area, tissue-total via the tissue mask.
    pc_p = jnp.sum(accp.reshape(C, S * acc_w), axis=1) * voxel_area
    pc_t = jnp.sum(acct.reshape(C, S * acc_w), axis=1) * voxel_area
    tot_p = jnp.sum(pc_p * tissue_mask, keepdims=True)
    tot_t = jnp.sum(pc_t * tissue_mask, keepdims=True)
    return jnp.concatenate([pc_p, tot_p]), jnp.concatenate([pc_t, tot_t])


_tissue_volume_jit = jax.jit(_tissue_volume_impl, static_argnames=("max_tile_bytes",))


def tissue_volume_pallas(y_pred, y_true, voxel_area, tissue_mask, *, max_tile_bytes=2 << 20):
    """Returns (vol_pred, vol_true), each (C+1,): [per-class volumes..., tissue total]."""
    return _tissue_volume_jit(
        jnp.asarray(y_pred), jnp.asarray(y_true),
        jnp.float32(voxel_area), jnp.asarray(tissue_mask, jnp.float32),
        max_tile_bytes=max_tile_bytes)


# ----------------------------------------------------------------------------
# Host-side glue mirroring the torch module (dicts, resize, aggregation)
# ----------------------------------------------------------------------------
def _resize_nearest(mask, rows, cols):
    """Nearest-neighbour resize of (..., h, w) -> (..., rows, cols), vectorized.
    # TODO(synk): may differ from skimage.transform.resize(order=0) by one pixel
    # at edges for non-integer scale factors."""
    h, w = mask.shape[-2], mask.shape[-1]
    if (h, w) == (rows, cols):
        return mask
    ri = jnp.clip(jnp.floor((jnp.arange(rows) + 0.5) * (h / rows)).astype(jnp.int32), 0, h - 1)
    ci = jnp.clip(jnp.floor((jnp.arange(cols) + 0.5) * (w / cols)).astype(jnp.int32), 0, w - 1)
    return jnp.take(jnp.take(mask, ri, axis=-2), ci, axis=-1)


class TissueVolumeMetricPallas:
    """JAX/Pallas port of TissueVolumeMetric (state handling stays on host)."""

    def __init__(self, reduction='mean_batch', class_names=None, tissue_labels=None):
        self.reduction = reduction
        self.class_names = class_names if class_names else ['Class{}'.format(i) for i in range(1)]
        self.num_classes = len(self.class_names)
        self.tissue_labels = tissue_labels if tissue_labels is not None else list(range(self.num_classes))
        self._tissue_mask = np.zeros((self.num_classes,), np.float32)
        for i in self.tissue_labels:
            if 0 <= i < self.num_classes:
                self._tissue_mask[i] = 1.0
        self.volumes_pred = {}
        self.volumes_true = {}

    def reset(self):
        self.volumes_pred = {}
        self.volumes_true = {}

    def update(self, y_pred, y, subject_slice_meta, subj_id, slice_id):
        voxel_area = (subject_slice_meta['pixel_spacing'][0]
                      * subject_slice_meta['pixel_spacing'][1]
                      * subject_slice_meta['slice_thickness'] / 1000.0)
        rows, cols = subject_slice_meta['rows'], subject_slice_meta['columns']

        yp = _resize_nearest(jnp.asarray(y_pred), rows, cols)
        yt = _resize_nearest(jnp.asarray(y), rows, cols)

        # TODO(synk): batch several slices per pallas_call when update() is
        # called in a tight loop to amortize launch overhead further.
        vol_pred, vol_true = tissue_volume_pallas(yp, yt, voxel_area, self._tissue_mask)

        key = f'{subj_id}_{slice_id}'
        if key not in self.volumes_pred:
            self.volumes_pred[key] = vol_pred            # stays on device; no sync here
            self.volumes_true[key] = vol_true
        else:
            self.volumes_pred[key] = self.volumes_pred[key] + vol_pred
            self.volumes_true[key] = self.volumes_true[key] + vol_true

    def _materialize(self):
        vp = {k: [float(x) for x in np.asarray(v)] for k, v in self.volumes_pred.items()}
        vt = {k: [float(x) for x in np.asarray(v)] for k, v in self.volumes_true.items()}
        return vp, vt

    def compute(self):
        vp, vt = self._materialize()                     # single host sync point
        for key in vp:
            for i in range(self.num_classes):
                if i not in self.tissue_labels:
                    vp[key][i] = np.nan
                    vt[key][i] = np.nan
        self.volumes_pred, self.volumes_true = vp, vt
        return (self.volumes_pred, self.volumes_true)

    def aggregate_by_subject(self):
        vp, vt = self._materialize()
        agg_p, agg_t = {}, {}
        for src, dst in ((vp, agg_p), (vt, agg_t)):
            for key, volumes in src.items():
                subj_id = key[:-4]
                if subj_id not in dst:
                    dst[subj_id] = [0.0] * (self.num_classes + 1)
                for i in range(self.num_classes):
                    if i in self.tissue_labels:
                        dst[subj_id][i] += volumes[i]
                    else:
                        dst[subj_id][i] = np.nan
                dst[subj_id][-1] += volumes[-1]
        return (agg_p, agg_t)

    def forward(self, *args, **kwargs):
        # Matches reference: forward is a no-op.
        pass


# ----------------------------------------------------------------------------
# Demo / self-check
# ----------------------------------------------------------------------------
if __name__ == "__main__":
    key = jax.random.PRNGKey(0)
    voxel_area = 0.8 * 0.8 * 3.0 / 1000.0
    C = 4
    tissue_labels = [0, 1, 2]
    tissue_mask = np.zeros((C,), np.float32)
    tissue_mask[tissue_labels] = 1.0

    def numpy_ref(yp, yt):
        p = np.asarray(yp, np.float64)[0].reshape(C, -1).sum(axis=1) * voxel_area
        t = np.asarray(yt, np.float64)[0].reshape(C, -1).sum(axis=1) * voxel_area
        return (np.concatenate([p, [p[tissue_labels].sum()]]),
                np.concatenate([t, [t[tissue_labels].sum()]]))

    def run_case(k, H, W, **kw):
        k1, k2 = jax.random.split(k)
        yp = (jax.random.uniform(k1, (1, C, H, W)) > 0.5).astype(jnp.float32)
        yt = (jax.random.uniform(k2, (1, C, H, W)) > 0.5).astype(jnp.float32)
        vp, vt = tissue_volume_pallas(yp, yt, voxel_area, tissue_mask, **kw)
        vp = jax.block_until_ready(vp)
        vt = jax.block_until_ready(vt)
        rp, rt = numpy_ref(yp, yt)
        np.testing.assert_allclose(np.asarray(vp), rp, rtol=1e-5, atol=1e-5)
        np.testing.assert_allclose(np.asarray(vt), rt, rtol=1e-5, atol=1e-5)

    keys = jax.random.split(key, 5)
    # 1) Small image -> single tile, partial-chunk path.
    run_case(keys[0], 16, 16)
    # 2) Forced multi-tile with a ragged spatial tail (in-kernel lane mask).
    #    wtot = 72*72/8 = 648, tile = 512 -> 2 tiles, tail_valid = 136.
    run_case(keys[1], 72, 72, max_tile_bytes=64 * 1024)
    # 3) Multi-tile, exact division (4 tiles of 512, no mask).
    run_case(keys[2], 128, 128, max_tile_bytes=64 * 1024)
    # 4) Spatial size not divisible by 8 -> sublane-packing fallback S=1.
    run_case(keys[3], 15, 15)

    # 5) Full metric-object path (kernel inside update()).
    H = W = 16
    meta = {'pixel_spacing': (0.8, 0.8), 'slice_thickness': 3.0, 'rows': H, 'columns': W}
    k1, k2 = jax.random.split(keys[4])
    y_pred = (jax.random.uniform(k1, (1, C, H, W)) > 0.5).astype(jnp.float32)
    y_true = (jax.random.uniform(k2, (1, C, H, W)) > 0.5).astype(jnp.float32)
    metric = TissueVolumeMetricPallas(class_names=[f'C{i}' for i in range(C)],
                                      tissue_labels=tissue_labels)
    metric.update(y_pred, y_true, meta, subj_id='subj0', slice_id='s001')
    vp_dict, vt_dict = metric.compute()
    rp, rt = numpy_ref(y_pred, y_true)
    got_p = np.asarray(vp_dict['subj0_s001'])
    got_t = np.asarray(vt_dict['subj0_s001'])
    for i in tissue_labels + [C]:
        np.testing.assert_allclose(got_p[i], rp[i], rtol=1e-5, atol=1e-5)
        np.testing.assert_allclose(got_t[i], rt[i], rtol=1e-5, atol=1e-5)
    metric.aggregate_by_subject()

    print("KERNEL_OK")
</pallas_src>

<mosaic_0001>
module attributes {stable_mosaic.version = 11 : i64} {
  func.func @_volume_kernel(%arg0: i32, %arg1: memref<32x32xf32, #tpu.memory_space<vmem>>, %arg2: memref<32x32xf32, #tpu.memory_space<vmem>>, %arg3: memref<32x128xf32, #tpu.memory_space<vmem>>, %arg4: memref<32x128xf32, #tpu.memory_space<vmem>>) attributes {dimension_semantics = [#tpu.dimension_semantics<arbitrary>], iteration_bounds = array<i64: 1>, scalar_prefetch = 0 : i64, scratch_operands = 0 : i64, tpu.core_type = #tpu.core_type<tc>, window_params = [{transform_indices = @transform_0, window_bounds = array<i64: 32, 32>}, {transform_indices = @transform_1, window_bounds = array<i64: 32, 32>}, {pipeline_mode = #tpu.pipeline_mode<synchronous>, transform_indices = @transform_2, window_bounds = array<i64: 32, 128>}, {pipeline_mode = #tpu.pipeline_mode<synchronous>, transform_indices = @transform_3, window_bounds = array<i64: 32, 128>}]} {
    %c0_i32 = arith.constant 0 : i32
    %0 = arith.cmpi eq, %arg0, %c0_i32 : i32
    %1 = arith.extui %0 : i1 to i32
    %c0_i32_0 = arith.constant 0 : i32
    %2 = arith.cmpi ne, %1, %c0_i32_0 : i32
    scf.if %2 {
      %cst = arith.constant 0.000000e+00 : f32
      %11 = vector.broadcast %cst : f32 to vector<32x128xf32>
      %c0_12 = arith.constant 0 : index
      %c0_13 = arith.constant 0 : index
      %12 = vector.load %arg3[%c0_12, %c0_13] : memref<32x128xf32, #tpu.memory_space<vmem>>, vector<32x128xf32>
      tpu.vector_store %arg3[%c0_12, %c0_13], %11 {strides = array<i32>} : memref<32x128xf32, #tpu.memory_space<vmem>>, vector<32x128xf32>,
      %cst_14 = arith.constant 0.000000e+00 : f32
      %13 = vector.broadcast %cst_14 : f32 to vector<32x128xf32>
      %c0_15 = arith.constant 0 : index
      %c0_16 = arith.constant 0 : index
      %14 = vector.load %arg4[%c0_15, %c0_16] : memref<32x128xf32, #tpu.memory_space<vmem>>, vector<32x128xf32>
      tpu.vector_store %arg4[%c0_15, %c0_16], %13 {strides = array<i32>} : memref<32x128xf32, #tpu.memory_space<vmem>>, vector<32x128xf32>,
    } else {
    }
    %c0 = arith.constant 0 : index
    %c0_1 = arith.constant 0 : index
    %3 = vector.load %arg1[%c0, %c0_1] : memref<32x32xf32, #tpu.memory_space<vmem>>, vector<32x32xf32>
    %c0_2 = arith.constant 0 : index
    %c0_3 = arith.constant 0 : index
    %4 = vector.load %arg3[%c0_2, %c0_3] : memref<32x128xf32, #tpu.memory_space<vmem>>, vector<32x32xf32>
    %5 = arith.addf %4, %3 : vector<32x32xf32>
    %c0_4 = arith.constant 0 : index
    %c0_5 = arith.constant 0 : index
    %6 = vector.load %arg3[%c0_4, %c0_5] : memref<32x128xf32, #tpu.memory_space<vmem>>, vector<32x32xf32>
    tpu.vector_store %arg3[%c0_4, %c0_5], %5 {strides = array<i32>} : memref<32x128xf32, #tpu.memory_space<vmem>>, vector<32x32xf32>,
    %c0_6 = arith.constant 0 : index
    %c0_7 = arith.constant 0 : index
    %7 = vector.load %arg2[%c0_6, %c0_7] : memref<32x32xf32, #tpu.memory_space<vmem>>, vector<32x32xf32>
    %c0_8 = arith.constant 0 : index
    %c0_9 = arith.constant 0 : index
    %8 = vector.load %arg4[%c0_8, %c0_9] : memref<32x128xf32, #tpu.memory_space<vmem>>, vector<32x32xf32>
    %9 = arith.addf %8, %7 : vector<32x32xf32>
    %c0_10 = arith.constant 0 : index
    %c0_11 = arith.constant 0 : index
    %10 = vector.load %arg4[%c0_10, %c0_11] : memref<32x128xf32, #tpu.memory_space<vmem>>, vector<32x32xf32>
    tpu.vector_store %arg4[%c0_10, %c0_11], %9 {strides = array<i32>} : memref<32x128xf32, #tpu.memory_space<vmem>>, vector<32x32xf32>,
    return
  }
  func.func @transform_0(%arg0: i32) -> (i32, i32) {
    %c0_i32 = arith.constant 0 : i32
    %c0_i32_0 = arith.constant 0 : i32
    return %c0_i32, %arg0 : i32, i32
  }
  func.func @transform_1(%arg0: i32) -> (i32, i32) {
    %c0_i32 = arith.constant 0 : i32
    %c0_i32_0 = arith.constant 0 : i32
    return %c0_i32, %arg0 : i32, i32
  }
  func.func @transform_2(%arg0: i32) -> (i32, i32) {
    %c0_i32 = arith.constant 0 : i32
    %c0_i32_0 = arith.constant 0 : i32
    %c0_i32_1 = arith.constant 0 : i32
    return %c0_i32, %c0_i32_0 : i32, i32
  }
  func.func @transform_3(%arg0: i32) -> (i32, i32) {
    %c0_i32 = arith.constant 0 : i32
    %c0_i32_0 = arith.constant 0 : i32
    %c0_i32_1 = arith.constant 0 : i32
    return %c0_i32, %c0_i32_0 : i32, i32
  }
}

</mosaic_0001>

<bundles_post_ra>
// kernel: _tissue_volume_impl.1
= control target key start
LH: loop header
LB: loop body
LE: loop exit
PB: predicated region body
PF: predicated region fallthrough
CT: control target
= control target key end

     0   :  { %v67_v0 = vmov 0.0   ;;  %vm37_vm0 = vcmask 261120   ;;  %s160_s2 = inlined_call_operand.vmem [shape: f32[32,128], index: 2, kind: output, shape index: {0}]   ;;  %s161_s3 = inlined_call_operand.vmem [shape: f32[32,128], index: 3, kind: output, shape index: {1}]   ;;  %s162_s0 = inlined_call_operand.vmem [shape: f32[32,32], index: 0, kind: input, shape index: {}]   ;;  %s163_s1 = inlined_call_operand.vmem [shape: f32[32,32], index: 1, kind: input, shape index: {}]  }
   0x1   :  { %17 = vst [vmem:[%s160_s2] sm:$0xff] %v67_v0  ;;  %18 = vst [vmem:[%s160_s2 + $0x8] sm:$0xff] %v67_v0  ;;  %v25_v1 = vld [vmem:[%s162_s0] sm:$0xff]  ;;  %v26_v2 = vld [vmem:[%s162_s0 + $0x8] sm:$0xff] }
   0x2   :  { %19 = vst [vmem:[%s160_s2 + $0x10] sm:$0xff] %v67_v0  ;;  %20 = vst [vmem:[%s160_s2 + $0x18] sm:$0xff] %v67_v0  ;;  %v27_v3 = vld [vmem:[%s162_s0 + $0x10] sm:$0xff]  ;;  %v28_v4 = vld [vmem:[%s162_s0 + $0x18] sm:$0xff] }
   0x3   :  { %21 = vst [vmem:[%s161_s3] sm:$0xff] %v67_v0  ;;  %22 = vst [vmem:[%s161_s3 + $0x8] sm:$0xff] %v67_v0  ;;  %v42_v5 = vld [vmem:[%s163_s1] sm:$0xff]  ;;  %v43_v6 = vld [vmem:[%s163_s1 + $0x8] sm:$0xff] }
   0x4   :  { %23 = vst [vmem:[%s161_s3 + $0x10] sm:$0xff] %v67_v0  ;;  %24 = vst [vmem:[%s161_s3 + $0x18] sm:$0xff] %v67_v0  ;;  %v44_v7 = vld [vmem:[%s163_s1 + $0x10] sm:$0xff]  ;;  %v45_v8 = vld [vmem:[%s163_s1 + $0x18] sm:$0xff] }
   0x5   :  { %38 = vst.msk [vmem:[%s160_s2] sm:$0xff] %vm37_vm0, %v25_v1  ;;  %39 = vst.msk [vmem:[%s160_s2 + $0x8] sm:$0xff] %vm37_vm0, %v26_v2 }
   0x6   :  { %40 = vst.msk [vmem:[%s160_s2 + $0x10] sm:$0xff] %vm37_vm0, %v27_v3  ;;  %41 = vst.msk [vmem:[%s160_s2 + $0x18] sm:$0xff] %vm37_vm0, %v28_v4 }
   0x7   :  { %54 = vst.msk [vmem:[%s161_s3] sm:$0xff] %vm37_vm0, %v42_v5  ;;  %55 = vst.msk [vmem:[%s161_s3 + $0x8] sm:$0xff] %vm37_vm0, %v43_v6 }
   0x8   :  { %56 = vst.msk [vmem:[%s161_s3 + $0x10] sm:$0xff] %vm37_vm0, %v44_v7  ;;  %57 = vst.msk [vmem:[%s161_s3 + $0x18] sm:$0xff] %vm37_vm0, %v45_v8 }

</bundles_post_ra>
